<compile_context>
chip_gen: v7x
topology: tpu7x:2x2x1
jax: 0.10.0
libtpu: 0.0.40
codegen_flags: <defaults>
</compile_context>

<pallas_src>
import jax
import jax.numpy as jnp
from jax import lax
from jax.experimental import pallas as pl
from jax.experimental.pallas import tpu as pltpu


def _prediction_kernel(c_ref, w_ref, cand_ref, out_ref):
    """One grid step == (one W tile, one prediction head k).

    c_ref    : (B, tW, A)        bf16  contextual features (resident across k)
    w_ref    : (P, E, A)         bf16  all prediction-head weights (resident, tiny)
    cand_ref : (1, B, N, tW, E)  bf16  candidates for head k, this W tile
    out_ref  : (1, B, tW, N)     f32   scores = (locC * candidates).mean over E
    """
    k = pl.program_id(1)
    B, tW, A = c_ref.shape
    E = w_ref.shape[1]
    N = cand_ref.shape[2]

    # locC = c @ W_k^T  (nn.Linear, bias=False); bf16 operands, f32 accumulation on MXU.
    c2 = c_ref[...].reshape(B * tW, A)              # tW is a multiple of 16 => layout-preserving
    wk = w_ref[k]                                   # (E, A), dynamic major-dim index
    locc = lax.dot_general(c2, wk, (((1,), (1,)), ((), ())),
                           preferred_element_type=jnp.float32)       # (B*tW, E) f32
    locc = locc.reshape(B, tW, E)
    # TODO(synk): optional nn.Dropout(p=0.5) on locC (constructor flag, default off,
    # training-only) is not implemented in-kernel.

    # scores[b, n, w] = mean_e locC[b, w, e] * cand[b, n, w, e]
    # Chunk the E (lane) reduction to bound live intermediates / avoid vreg spills.
    e_chunk = min(E, 128)
    scores = jnp.zeros((B, N, tW), jnp.float32)
    for e0 in range(0, E, e_chunk):
        ec = min(e_chunk, E - e0)
        lc = locc[:, :, e0:e0 + ec]                                   # (B, tW, ec)  f32
        cd = cand_ref[0, :, :, :, e0:e0 + ec].astype(jnp.float32)     # (B, N, tW, ec)
        scores = scores + jnp.sum(lc[:, None, :, :] * cd, axis=-1)    # (B, N, tW)
    scores = scores * (1.0 / E)

    # Output block keeps N (a full dim) on the lane axis so the store is well-formed.
    out_ref[0] = jnp.swapaxes(scores, 1, 2)                           # (B, tW, N)


def _choose_tile_w(W, B, N, E, itemsize, budget_bytes=4 << 20):
    """Largest tW (multiple of 16, divides W) whose candidate block fits the budget."""
    row_bytes = B * N * E * itemsize
    best = None
    for t in range(16, W + 1, 16):
        if W % t == 0 and t * row_bytes <= budget_bytes:
            best = t
    return best if best is not None else 16


def prediction_network_forward(c, weights, candidates, *, tile_w=None,
                               stream_dtype=jnp.bfloat16):
    """Mirrors PredictionNetwork.forward.

    c          : (B, W, dimAR)
    weights    : (P, dimEnc, dimAR)        stacked nn.Linear weights (bias=False)
    candidates : (P, B, N, W, dimEnc)      candidates[k] per head, PyTorch layout
    returns    : list of P arrays, each (B, N, W) float32
    """
    P, E, A = weights.shape
    B, W, A2 = c.shape
    Pc, Bc, N, Wc, Ec = candidates.shape
    assert A2 == A and (Pc, Bc, Wc, Ec) == (P, B, W, E)

    if tile_w is None:
        tile_w = _choose_tile_w(W, B, N, E, jnp.dtype(stream_dtype).itemsize)
    assert tile_w % 16 == 0, "tile_w must be a multiple of 16 (bf16 sublane packing)"
    assert W % tile_w == 0, "sequence length must be divisible by tile_w"

    c_s = c.astype(stream_dtype)
    w_s = weights.astype(stream_dtype)
    cand_s = candidates.astype(stream_dtype)

    grid = (W // tile_w, P)  # (W-tile, head); head innermost for c/weight residency
    out = pl.pallas_call(
        _prediction_kernel,
        out_shape=jax.ShapeDtypeStruct((P, B, W, N), jnp.float32),
        grid_spec=pltpu.PrefetchScalarGridSpec(
            num_scalar_prefetch=0,
            grid=grid,
            in_specs=[
                pl.BlockSpec((B, tile_w, A), lambda wt, k: (0, wt, 0)),
                pl.BlockSpec((P, E, A), lambda wt, k: (0, 0, 0)),
                pl.BlockSpec((1, B, N, tile_w, E), lambda wt, k: (k, 0, 0, wt, 0)),
            ],
            out_specs=pl.BlockSpec((1, B, tile_w, N), lambda wt, k: (k, 0, wt, 0)),
        ),
        compiler_params=pltpu.CompilerParams(
            dimension_semantics=("parallel", "arbitrary"),
            vmem_limit_bytes=32 * 1024 * 1024,
        ),
    )(c_s, w_s, cand_s)

    out = jnp.transpose(out, (0, 1, 3, 2))  # (P, B, N, W), PyTorch output layout
    return [out[k] for k in range(P)]


def init_prediction_weights(key, n_predicts, dim_ar, dim_enc):
    """Mirrors PredictionNetwork.__init__ (residual-std init when dimEnc > dimAR)."""
    ws = []
    for _ in range(n_predicts):
        key, k1, k2 = jax.random.split(key, 3)
        if dim_enc > dim_ar:
            top = jax.random.normal(k1, (dim_ar, dim_ar), dtype=jnp.float32)
            bot = 0.01 * jax.random.normal(k2, (dim_enc - dim_ar, dim_ar),
                                           dtype=jnp.float32)
            w = jnp.concatenate([top, bot], axis=0)
        else:
            bound = 1.0 / (dim_ar ** 0.5)
            w = jax.random.uniform(k1, (dim_enc, dim_ar), minval=-bound,
                                   maxval=bound, dtype=jnp.float32)
        ws.append(w)
    return jnp.stack(ws, axis=0)  # (P, E, A)


if __name__ == "__main__":
    # Small shapes consistent with the module's forward.
    B, W = 2, 32
    dimAR, dimEnc = 32, 64
    n_predicts = 4
    n_candidates = 9  # e.g. 1 positive + 8 negatives per step

    key = jax.random.PRNGKey(0)
    k_c, k_cand, k_w = jax.random.split(key, 3)
    c = jax.random.normal(k_c, (B, W, dimAR), dtype=jnp.float32)
    candidates = jax.random.normal(
        k_cand, (n_predicts, B, n_candidates, W, dimEnc), dtype=jnp.float32)
    weights = init_prediction_weights(k_w, n_predicts, dimAR, dimEnc)

    outs = prediction_network_forward(c, weights, candidates, tile_w=16)
    outs = jax.block_until_ready(outs)

    # Reference (same bf16-rounded inputs, f32 math) mirroring the torch forward.
    c32 = c.astype(jnp.bfloat16).astype(jnp.float32)
    w32 = weights.astype(jnp.bfloat16).astype(jnp.float32)
    cand32 = candidates.astype(jnp.bfloat16).astype(jnp.float32)
    for k in range(n_predicts):
        locc = jnp.einsum("bwa,ea->bwe", c32, w32[k],
                          precision=lax.Precision.HIGHEST)
        ref_k = jnp.mean(locc[:, None, :, :] * cand32[k], axis=3)  # (B, N, W)
        assert outs[k].shape == (B, n_candidates, W)
        err = float(jnp.max(jnp.abs(outs[k] - ref_k)))
        assert jnp.allclose(outs[k], ref_k, rtol=2e-2, atol=2e-2), (k, err)
    print("KERNEL_OK")
</pallas_src>

<mosaic_0001>
module attributes {stable_mosaic.version = 11 : i64} {
  func.func @_prediction_kernel(%arg0: i32, %arg1: i32, %arg2: memref<2x16x32xbf16, #tpu.memory_space<vmem>>, %arg3: memref<4x64x32xbf16, #tpu.memory_space<vmem>>, %arg4: memref<1x2x9x16x64xbf16, #tpu.memory_space<vmem>>, %arg5: memref<1x2x16x9xf32, #tpu.memory_space<vmem>>) attributes {dimension_semantics = [#tpu.dimension_semantics<parallel>, #tpu.dimension_semantics<arbitrary>], iteration_bounds = array<i64: 2, 4>, scalar_prefetch = 0 : i64, scratch_operands = 0 : i64, tpu.core_type = #tpu.core_type<tc>, window_params = [{transform_indices = @transform_0, window_bounds = array<i64: 2, 16, 32>}, {pipeline_mode = #tpu.pipeline_mode<synchronous>, transform_indices = @transform_1, window_bounds = array<i64: 4, 64, 32>}, {transform_indices = @transform_2, window_bounds = array<i64: 1, 2, 9, 16, 64>}, {transform_indices = @transform_3, window_bounds = array<i64: 1, 2, 16, 9>}]} {
    %c0 = arith.constant 0 : index
    %c0_0 = arith.constant 0 : index
    %c0_1 = arith.constant 0 : index
    %0 = vector.load %arg2[%c0, %c0_0, %c0_1] : memref<2x16x32xbf16, #tpu.memory_space<vmem>>, vector<2x16x32xbf16>
    %1 = vector.shape_cast %0 : vector<2x16x32xbf16> to vector<32x32xbf16>
    %2 = arith.index_cast %arg1 : i32 to index
    %c0_2 = arith.constant 0 : index
    %c0_3 = arith.constant 0 : index
    %3 = vector.load %arg3[%2, %c0_2, %c0_3] : memref<4x64x32xbf16, #tpu.memory_space<vmem>>, vector<1x64x32xbf16>
    %4 = vector.shape_cast %3 : vector<1x64x32xbf16> to vector<64x32xbf16>
    %cst = arith.constant dense<0.000000e+00> : vector<32x64xf32>
    %5 = tpu.matmul %1, %4, %cst {dimension_numbers = #tpu.dot_dimension_numbers<[1], [1], [0], [0], [0, 0, 1, 0], [], []>} : vector<32x32xbf16>, vector<64x32xbf16>, vector<32x64xf32> -> vector<32x64xf32>
    %6 = vector.shape_cast %5 : vector<32x64xf32> to vector<2x16x64xf32>
    %cst_4 = arith.constant 0.000000e+00 : f32
    %7 = vector.broadcast %cst_4 : f32 to vector<2x9x16xf32>
    %c0_5 = arith.constant 0 : index
    %c0_6 = arith.constant 0 : index
    %c0_7 = arith.constant 0 : index
    %c0_8 = arith.constant 0 : index
    %c0_9 = arith.constant 0 : index
    %8 = vector.load %arg4[%c0_5, %c0_6, %c0_7, %c0_8, %c0_9] : memref<1x2x9x16x64xbf16, #tpu.memory_space<vmem>>, vector<1x2x9x16x64xbf16>
    %9 = vector.shape_cast %8 : vector<1x2x9x16x64xbf16> to vector<2x9x16x64xbf16>
    %10 = arith.extf %9 : vector<2x9x16x64xbf16> to vector<2x9x16x64xf32>
    %11 = vector.shape_cast %6 : vector<2x16x64xf32> to vector<2x1x16x64xf32>
    %12 = vector.broadcast %11 : vector<2x1x16x64xf32> to vector<2x9x16x64xf32>
    %13 = arith.mulf %12, %10 : vector<2x9x16x64xf32>
    %cst_10 = arith.constant dense<0.000000e+00> : vector<2x9x16xf32>
    %14 = vector.multi_reduction <add>, %13, %cst_10 [3] : vector<2x9x16x64xf32> to vector<2x9x16xf32>
    %15 = arith.addf %7, %14 : vector<2x9x16xf32>
    %cst_11 = arith.constant 1.562500e-02 : f32
    %16 = vector.broadcast %cst_11 : f32 to vector<2x9x16xf32>
    %17 = arith.mulf %15, %16 : vector<2x9x16xf32>
    %18 = tpu.transpose %17, [0, 2, 1] : vector<2x9x16xf32> -> vector<2x16x9xf32>
    %c0_12 = arith.constant 0 : index
    %c0_13 = arith.constant 0 : index
    %c0_14 = arith.constant 0 : index
    %c0_15 = arith.constant 0 : index
    %19 = vector.load %arg5[%c0_12, %c0_13, %c0_14, %c0_15] : memref<1x2x16x9xf32, #tpu.memory_space<vmem>>, vector<1x2x16x9xf32>
    %20 = vector.shape_cast %19 : vector<1x2x16x9xf32> to vector<2x16x9xf32>
    %21 = vector.shape_cast %18 : vector<2x16x9xf32> to vector<1x2x16x9xf32>
    tpu.vector_store %arg5[%c0_12, %c0_13, %c0_14, %c0_15], %21 {strides = array<i32>} : memref<1x2x16x9xf32, #tpu.memory_space<vmem>>, vector<1x2x16x9xf32>,
    return
  }
  func.func @transform_0(%arg0: i32, %arg1: i32) -> (i32, i32, i32) {
    %c0_i32 = arith.constant 0 : i32
    %c0_i32_0 = arith.constant 0 : i32
    %c0_i32_1 = arith.constant 0 : i32
    return %c0_i32, %arg0, %c0_i32_0 : i32, i32, i32
  }
  func.func @transform_1(%arg0: i32, %arg1: i32) -> (i32, i32, i32) {
    %c0_i32 = arith.constant 0 : i32
    %c0_i32_0 = arith.constant 0 : i32
    %c0_i32_1 = arith.constant 0 : i32
    %c0_i32_2 = arith.constant 0 : i32
    return %c0_i32, %c0_i32_0, %c0_i32_1 : i32, i32, i32
  }
  func.func @transform_2(%arg0: i32, %arg1: i32) -> (i32, i32, i32, i32, i32) {
    %c0_i32 = arith.constant 0 : i32
    %c0_i32_0 = arith.constant 0 : i32
    %c0_i32_1 = arith.constant 0 : i32
    %c0_i32_2 = arith.constant 0 : i32
    return %arg1, %c0_i32, %c0_i32_0, %arg0, %c0_i32_1 : i32, i32, i32, i32, i32
  }
  func.func @transform_3(%arg0: i32, %arg1: i32) -> (i32, i32, i32, i32) {
    %c0_i32 = arith.constant 0 : i32
    %c0_i32_0 = arith.constant 0 : i32
    %c0_i32_1 = arith.constant 0 : i32
    return %arg1, %c0_i32, %arg0, %c0_i32_0 : i32, i32, i32, i32
  }
}

</mosaic_0001>

<bundles_post_ra>
// kernel: tpu_custom_call.1
= control target key start
LH: loop header
LB: loop body
LE: loop exit
PB: predicated region body
PF: predicated region fallthrough
CT: control target
= control target key end

     0   :  { %s1924_s0 = inlined_call_operand.vmem [shape: bf16[2,32,32], index: 0, kind: input, shape index: {}]   ;;  %s1925_s1 = inlined_call_operand.vmem [shape: bf16[4,64,32], index: 1, kind: input, shape index: {}]   ;;  %s1926_s2 = inlined_call_operand.hbm [shape: bf16[4,2,9,32,64], index: 2, kind: input, shape index: {}]   ;;  %s1927_s3 = inlined_call_operand.vmem [shape: f32[4,2,32,9], index: 3, kind: output, shape index: {}]  }
   0x1   :  { %1931 = sst [smem:[#allocation13_spill]] %s1924_s0 }
   0x2   :  { %8 = vsyncpa [#allocation4], 0 }
   0x3   :  { %10 = vsyncpa [#allocation4 + $0x1], 0  ;;  %s1517_s12 = smov 0   ;;  %s1519_s13 = smov 0  }
   0x4   :  { %s1521_s14 = smov 0   ;;  %s1523_s15 = smov 0  }
   0x5   :  { %s1525_s16 = smov 0   ;;  %s1527_s17 = smov 0  }
   0x6   :  { %s1529_s18 = smov 0   ;;  %s1531_s19 = smov 0  }
   0x7   :  { %s1533_s20 = smov 0   ;;  %s1535_s21 = smov 0  }
   0x8 LB: > { %1932 = sst [smem:[#allocation10_spill]] %s1485_s20  ;;  %s1159_s22 = sadd.s32 4294967295, %s1489_s21   ;;  %s1489_s21 = sphi %s1535_s21, %s16_s21   ;;  %s1485_s20 = sphi %s1533_s20, %s1942_s20   ;;  %s1481_s19 = sphi %s1531_s19, %s1949_s19   ;;  %s1477_s18 = sphi %s1529_s18, %s1940_s18   ;;  %s1473_s17 = sphi %s1527_s17, %s1948_s17   ;;  %s1469_s16 = sphi %s1525_s16, %s1947_s16   ;;  %s1465_s15 = sphi %s1523_s15, %s1946_s15   ;;  %s1461_s14 = sphi %s1521_s14, %s1945_s14   ;;  %s1457_s13 = sphi %s1519_s13, %s1944_s13   ;;  %s1453_s12 = sphi %s1517_s12, %s1943_s12  }
   0x9   : > { %s25_s23 = sadd.s32 1, %s1481_s19  ;;  %s28_s24 = sadd.s32 1, %s1485_s20 }
   0xa   : > { %p26_p0 = scmp.ge.s32.totalorder %s25_s23, 4  ;;  %s35_s25 = sadd.s32 1, %s1469_s16 }
   0xb   : > { %p42_p1 = scmp.ne.s32.totalorder %s1469_s16, %s1465_s15  ;;  %p43_p2 = scmp.eq.s32.totalorder %s1489_s21, 0 }
   0xc   : > { %s1951_s23 = smov (%p26_p0, %s25_s23), 0  ;;  %s1953_s24 = smov (!%p26_p0, %s28_s24), %s1485_s20 }
   0xd   : > { %1933 = sst [smem:[#allocation11_spill]] %s1951_s23  ;;  %s79_s26 = ssub.s32 %s1481_s19, %s1951_s23 }
   0xe   : > { %p30_p3 = scmp.ge.s32.totalorder %s1953_s24, 2  ;;  %s84_s27 = sadd.s32 1, %s1461_s14 }
   0xf   : > { %p1580_p4 = por %p43_p2, %p42_p1  ;;  %p91_p5 = scmp.ne.s32.totalorder %s1461_s14, %s1457_s13 }
  0x10   : > { %s1955_s24 = smov (%p30_p3, %s1953_s24), 0  ;;  %p97_p7 = scmp.ne.s32.totalorder %s1457_s13, %s1453_s12 }
  0x11   : > { %1935 = sst [smem:[#allocation12_spill]] %s1955_s24  ;;  %p1591_p6 = por %p91_p5, %p43_p2 }
  0x12   : > { %s32_s30 = ssub.s32 %s1485_s20, %s1955_s24  ;;  %p98_p8 = scmp.eq.s32.totalorder %s1159_s22, 0 }
  0x13   : > { %p33_p9 = scmp.eq.s32.totalorder %s32_s30, 0  ;;  %s81_s4 = sor.u32 %s79_s26, %s32_s30 }
  0x14   : > { %p82_p10 = scmp.eq.s32.totalorder %s81_s4, 0  ;;  %p1599_p11 = por %p98_p8, %p97_p7 }
  0x15   : > { %s1604_s6 = scalar_select %p33_p9, %s1469_s16, %s35_s25  }
  0x16   : > { %s1607_s7 = scalar_select %p82_p10, %s1461_s14, %s84_s27  }
  0x17   : > { %p123_p12 = scmp.eq.s32.totalorder %s1159_s22, 7  ;;  %p1162_p0 = scmp.ge.s32.totalorder %s1489_s21, 8 }
  0x19   : > { %p1612_p13 = por %p123_p12, %p91_p5  ;;  %148 = sbr.rel (%p1162_p0) target bundleno = 59 (0x3b), region = 20 }
  0x20   : > { %151 = sbr.rel (!%p1580_p4) target bundleno = 43 (0x2b), region = 24  ;;  %s153_s9 = sand.u32 (%p1580_p4), 1, %s1469_s16  }
  0x21   : > { %s1189_s10 = sshll.u32 (%p1580_p4), %s1485_s20, 3  ;;  %s1163_s11 = sshll.u32 (%p1580_p4), %s153_s9, 4 }
  0x22   : > { %s1939_s0 = sld [smem:[#allocation13_spill]] (%p1580_p4)  ;;  %s155_s26 = scalar_lea.vmem (%p1580_p4), [#allocation2], %s1163_s11 }
  0x28   : > { %s158_s22 = scalar_lea.vmem %s1939_s0, %s1189_s10 }
  0x29   : > { %v174_v0 = vld [vmem:[%s158_s22] sm:$0xff]   ;;  %v178_v1 = vld [vmem:[%s158_s22 + $0x10] sm:$0xff]  }
  0x2a   : > { %175 = vst [vmem:[%s155_s26] sm:$0xff] %v174_v0   ;;  %179 = vst [vmem:[%s155_s26 + $0x8] sm:$0xff] %v178_v1  }
  0x2b PF: > { %s213_s27 = sand.u32 1, %s1461_s14   ;;  %s1166_s30 = sshll.u32 %s1485_s20, 1 }
  0x2c   : > { %s1302_s28 = smul.u32 144, %s213_s27  ;;  %s1491_s9 = smov 256  }
  0x2d   : > { %s1303_s4 = smul.u32 72, %s1481_s19  ;;  %1306 = sst [smem:[#allocation7]] (%p1591_p6), %s1491_s9 }
  0x2e   : > { %s217_s11 = scalar_lea.vmem [#allocation3], %s1302_s28  ;;  %s1492_s22 = smov 128  }
  0x2f   : > { %s223_s10 = sadd.s32 %s1303_s4, %s1166_s30  ;;  %s238_s12 = sshll.u32 %s217_s11, 4  ;;  %s239_s12 = int_to_ptr.vmem [resolvable:$true] %s238_s12 }
  0x30   : > { %s1305_s25 = scalar_select %p1591_p6, [#allocation0], [#allocation8] }
  0x31   : > { %1307 = sst [smem:[#allocation7 + $0x1]] (%p1591_p6), %s1492_s22  ;;  %s1493_s0 = smov 2  }
  0x32   : > { %s230_s26 = sld [smem:[%s1305_s25]]   ;;  %s1167_s24 = sshll.u32 %s223_s10, 6 }
  0x33   : > { %1308 = sst [smem:[#allocation7 + $0x2]] (%p1591_p6), %s1493_s0  ;;  %s1494_s23 = smov 64  }
  0x34   : > { %1309 = sst [smem:[#allocation7 + $0x3]] (%p1591_p6), %s1494_s23  ;;  %s1495_s30 = smov 4  }
  0x35   : > { %1310 = sst [smem:[#allocation7 + $0x4]] (%p1591_p6), %s1494_s23  ;;  %s225_s9 = scalar_lea.hbm %s1926_s2, %s1167_s24 }
  0x36   : > { %1311 = sst [smem:[#allocation7 + $0x5]] (%p1591_p6), %s1495_s30  ;;  %s214_s25 = scalar_lea.sflag [#allocation4], %s213_s27 }
  0x37   : > { %s1496_s20 = smov [#allocation6]  }
  0x38   : > { %s1168_s11 = sshll.u32 %s230_s26, 26 }
  0x39   : > { %s1169_s22 = sadd.s32 134217728, %s1168_s11 }
  0x3a   : > { %1312 = dma.general (%p1591_p6), %s225_s9, 2304, %s239_s12, %s214_s25, %s1496_s20, [#allocation7], %s1169_s22, 0  }
  0x3b PF: > { %p1170_p1 = scmp.ge.s32.totalorder %s1489_s21, 1  ;;  %p259_p2 = scmp.lt.s32.totalorder %s1489_s21, 9 }
  0x3d   : > { %p260_p3 = pnand %p1170_p1, %p259_p2 }
  0x3e   : > { %s266_s0 = sand.u32 (!%p260_p3), 1, %s1465_s15   ;;  %s1650_s23 = sand.u32 (!%p260_p3), 1, %s1457_s13  }
  0x3f   : > { %263 = sbr.rel (%p260_p3) target bundleno = 675 (0x2a3), region = 69  ;;  %s1171_s24 = sshll.u32 (!%p260_p3), %s266_s0, 4 }
  0x40   : > { %s1304_s27 = smul.u32 (!%p260_p3), 144, %s1650_s23  ;;  %s268_s10 = scalar_lea.vmem (!%p260_p3), [#allocation2], %s1171_s24 }
  0x41   : > { %s273_s29 = scalar_lea.sflag (!%p260_p3), [#allocation4], %s1650_s23 }
  0x42   : > { %s1654_s20 = scalar_lea.vmem (!%p260_p3), [#allocation3], %s1304_s27 }
  0x46   : > { %1448 = dma.done.wait (%p1599_p11), %s273_s29, 2304  }
  0x47   : > { %1450 = vsyncadd (%p1599_p11), %s273_s29, 4294964992  ;;  %s1190_s12 = sshll.u32 %s1473_s17, 5  ;;  %vm351_vm0 = vcmask 261120   ;;  %v1405_v5 = vld [vmem:[%s268_s10] sm:$0xff]   ;;  %v1406_v11 = vld [vmem:[%s268_s10 + $0x8] sm:$0xff]   ;;  %vm527_vm1 = vcmask 523264  }
  0x48   : > { %s312_s15 = scalar_lea.vmem %s1925_s1, %s1190_s12  ;;  %1294 = vmatprep.mubr.msk.bf16.mxu0 %vm351_vm0, %v1405_v5  ;;  %v1271_v12 = vld [vmem:[%s1654_s20 + $0x48] sm:$0xff]   ;;  %v1272_v14 = vld [vmem:[%s1654_s20 + $0x50] sm:$0xff]   ;;  %v1273_v20 = vld [vmem:[%s1654_s20 + $0x58] sm:$0xff]   ;;  %vm755_vm2 = vcmask 130112   ;;  %vm910_vm3 = vcmask 1041409   ;;  %vm912_vm4 = vcmask 1042434  }
  0x49   : > { %v1401_v2 = vld [vmem:[%s312_s15] sm:$0xff]   ;;  %v1402_v3 = vld [vmem:[%s312_s15 + $0x8] sm:$0xff]   ;;  %v1403_v7 = vld [vmem:[%s312_s15 + $0x10] sm:$0xff]   ;;  %v1229_v15 = vunpack.c.l.bf16 %v1271_v12  ;;  %v1233_v17 = vunpack.c.l.bf16 %v1272_v14  ;;  %v1230_v19 = vunpack.c.h.bf16 %v1271_v12  ;;  %v1237_v28 = vunpack.c.l.bf16 %v1273_v20  ;;  %s1172_s5 = sshll.u32 %s1650_s23, 5  ;;  %s1184_s4 = sshll.u32 (%p1612_p13), %s1477_s18, 1 }
  0x4a   : > { %1298 = vmatprep.subr.msk.bf16.mxu0 %vm351_vm0, %v1401_v2  ;;  %v359_v4 = vsel %vm351_vm0, %v1401_v2, 0  ;;  %v362_v6 = vsel %vm351_vm0, %v1402_v3, 0  ;;  %v365_v8 = vsel %vm351_vm0, %v1403_v7, 0  ;;  %v1404_v9 = vld [vmem:[%s312_s15 + $0x18] sm:$0xff]   ;;  %v1234_v31 = vunpack.c.h.bf16 %v1272_v14  ;;  %v1274_v32 = vld [vmem:[%s1654_s20 + $0x60] sm:$0xff]   ;;  %v1276_v46 = vld [vmem:[%s1654_s20 + $0x70] sm:$0xff]  }
  0x4b   : > { %1287 = vmatpush3.bf16.xpose.msra.mxu0 %v359_v4  ;;  %v368_v10 = vsel %vm351_vm0, %v1404_v9, 0  ;;  %v1676_v13 = vld [vmem:[%s1654_s20 + $0x8] sm:$0xff]   ;;  %v1241_v35 = vunpack.c.l.bf16 %v1274_v32  ;;  %v1238_v39 = vunpack.c.h.bf16 %v1273_v20  ;;  %v1270_v41 = vld [vmem:[%s1654_s20 + $0x40] sm:$0xff]   ;;  %v1242_v45 = vunpack.c.h.bf16 %v1274_v32  ;;  %v1277_v59 = vld [vmem:[%s1654_s20 + $0x78] sm:$0xff]   ;;  %s301_s28 = scalar_lea.vmem [#allocation5], %s1172_s5  ;;  %s1185_s9 = sshll.u32 (%p1612_p13), %s1473_s17, 3 }
  0x4c   : > { %1299 = vmatprep.subr.msk.bf16.mxu0 %vm351_vm0, %v1402_v3  ;;  %v1197_v16 = vunpack.c.l.bf16 %v1676_v13  ;;  %v1275_v36 = vld [vmem:[%s1654_s20 + $0x68] sm:$0xff]   ;;  %v1225_v50 = vunpack.c.l.bf16 %v1270_v41  ;;  %v1226_v51 = vunpack.c.h.bf16 %v1270_v41  ;;  %v1249_v53 = vunpack.c.l.bf16 %v1276_v46  ;;  %s1013_s11 = sadd.s32 (%p1612_p13), %s1185_s9, %s1184_s4 }
  0x4d   : > { %v1279_v40 = vld [vmem:[%s1654_s20 + $0x88] sm:$0xff]   ;;  %v1245_v42 = vunpack.c.l.bf16 %v1275_v36  ;;  %v1246_v57 = vunpack.c.h.bf16 %v1275_v36  ;;  %v1253_v5 = vunpack.c.l.bf16 %v1277_v59  ;;  %v1198_v36 = vunpack.c.h.bf16 %v1676_v13  ;;  %s1186_s22 = sshll.u32 (%p1612_p13), %s1013_s11, 3 }
  0x4e   : > { %v1261_v47 = vunpack.c.l.bf16 %v1279_v40  ;;  %v1262_v52 = vunpack.c.h.bf16 %v1279_v40  ;;  %vm914_vm5 = vcmask 1043459   ;;  %vm916_vm6 = vcmask 1044484   ;;  %s1015_s23 = scalar_lea.vmem (%p1612_p13), %s1927_s3, %s1186_s22 }
  0x4f   : > { %vm918_vm7 = vcmask 1045509   ;;  %vm920_vm8 = vcmask 1046534   ;;  %vm922_vm9 = vcmask 1047559   ;;  %vm999_vm10 = vcmask 72704  }
  0x53   : > { %1289 = vmatpush3.bf16.xpose.msra.mxu0 %v362_v6 }
  0x54   : > { %1300 = vmatprep.subr.msk.bf16.mxu0 %vm351_vm0, %v1403_v7 }
  0x5b   : > { %1291 = vmatpush3.bf16.xpose.msra.mxu0 %v365_v8 }
  0x5c   : > { %1301 = vmatprep.subr.msk.bf16.mxu0 %vm351_vm0, %v1404_v9  ;;  %v1250_v9 = vunpack.c.h.bf16 %v1276_v46 }
  0x63   : > { %1293 = vmatpush3.bf16.xpose.msra.mxu0 %v368_v10  ;;  %v1734_v10 = vld [vmem:[%s1654_s20] sm:$0xff]  }
  0x64   : > { %v1193_v14 = vunpack.c.l.bf16 %v1734_v10 }
  0x6a   : > { %1295 = vmatmul.mubr.msk.bf16.vlgmr.msra.gmra.mrb[0].mxu0 %vm351_vm0, %v1406_v11 }
 0x13d   : > { %v1680_v18 = vpop.f32.mrb[0].mxu0 }
 0x13e   : > { %v1683_v21 = vpop.f32.mrb[1].mxu0  ;;  %v509_v22 = vmul.f32 %v1680_v18, %v1229_v15  ;;  %v511_v27 = vmul.f32 %v1680_v18, %v1233_v17  ;;  %v513_v34 = vmul.f32 %v1680_v18, %v1237_v28  ;;  %v515_v44 = vmul.f32 %v1680_v18, %v1241_v35 }
 0x13f   : > { %v1686_v23 = vpop.f32.mrb[2].mxu0  ;;  %v493_v24 = vmul.f32 %v1197_v16, %v1683_v21  ;;  %v517_v55 = vmul.f32 %v1680_v18, %v1245_v42  ;;  %v507_v60 = vmul.f32 %v1225_v50, %v1683_v21  ;;  %v525_v62 = vmul.f32 %v1680_v18, %v1261_v47 }
 0x140   : > { %v1689_v25 = vpop.f32.mrb[3].mxu0  ;;  %v582_v26 = vsel %vm527_vm1, %v509_v22, 0.0  ;;  %v510_v30 = vmul.f32 %v1686_v23, %v1230_v19  ;;  %v588_v33 = vsel %vm527_vm1, %v511_v27, 0.0  ;;  %v512_v38 = vmul.f32 %v1686_v23, %v1234_v31  ;;  %v1264_v19 = vld [vmem:[%s1654_s20 + $0x10] sm:$0xff]  }
 0x141   : > { %583 = vadd.xlane.f32.xlu0 %v582_v26  ;;  %v534_v29 = vsel %vm527_vm1, %v493_v24, 0.0  ;;  %v594_v43 = vsel %vm527_vm1, %v513_v34, 0.0  ;;  %v514_v49 = vmul.f32 %v1686_v23, %v1238_v39  ;;  %v600_v54 = vsel %vm527_vm1, %v515_v44, 0.0  ;;  %v1745_v26 = vld [vmem:[%s1654_s20 + $0x80] sm:$0xff]   ;;  %v1267_v44 = vld [vmem:[%s1654_s20 + $0x28] sm:$0xff]  }
 0x142   : > { %535 = vadd.xlane.f32.xlu1 %v534_v29  ;;  %v585_v37 = vsel %vm527_vm1, %v510_v30, 0.0  ;;  %v591_v48 = vsel %vm527_vm1, %v512_v38, 0.0  ;;  %v516_v56 = vmul.f32 %v1686_v23, %v1242_v45  ;;  %v508_v61 = vmul.f32 %v1226_v51, %v1689_v25  ;;  %v1265_v30 = vld [vmem:[%s1654_s20 + $0x18] sm:$0xff]  }
 0x143   : > { %v597_v58 = vsel %vm527_vm1, %v514_v49, 0.0  ;;  %v526_v63 = vmul.f32 %v1686_v23, %v1262_v52  ;;  %v1718_v0 = vsel %vm527_vm1, %v507_v60, 0.0  ;;  %v1724_v2 = vsel %vm527_vm1, %v525_v62, 0.0  ;;  %v1268_v49 = vld [vmem:[%s1654_s20 + $0x30] sm:$0xff]  }
 0x144   : > { %v1721_v1 = vsel %vm527_vm1, %v508_v61, 0.0  ;;  %v606_v3 = vsel %vm527_vm1, %v517_v55, 0.0  ;;  %v519_v4 = vmul.f32 %v1680_v18, %v1249_v53  ;;  %v603_v7 = vsel %vm527_vm1, %v516_v56, 0.0  ;;  %v1269_v56 = vld [vmem:[%s1654_s20 + $0x38] sm:$0xff]  }
 0x145   : > { %589 = vadd.xlane.f32.xlu0 %v588_v33  ;;  %v1729_v6 = vsel %vm527_vm1, %v526_v63, 0.0  ;;  %v518_v8 = vmul.f32 %v1686_v23, %v1246_v57  ;;  %v521_v12 = vmul.f32 %v1680_v18, %v1253_v5  ;;  %v520_v16 = vmul.f32 %v1686_v23, %v1250_v9 }
 0x146   : > { %586 = vadd.xlane.f32.xlu1 %v585_v37  ;;  %v612_v11 = vsel %vm527_vm1, %v519_v4, 0.0  ;;  %v1254_v17 = vunpack.c.h.bf16 %v1277_v59  ;;  %v491_v22 = vmul.f32 %v1193_v14, %v1683_v21  ;;  %v1201_v24 = vunpack.c.l.bf16 %v1264_v19  ;;  %v1266_v37 = vld [vmem:[%s1654_s20 + $0x20] sm:$0xff]  }
 0x147   : > { %v609_v15 = vsel %vm527_vm1, %v518_v8, 0.0  ;;  %v618_v20 = vsel %vm527_vm1, %v521_v12, 0.0  ;;  %v615_v27 = vsel %vm527_vm1, %v520_v16, 0.0  ;;  %v1258_v29 = vunpack.c.h.bf16 %v1745_v26 }
 0x148   : > { %v522_v28 = vmul.f32 %v1686_v23, %v1254_v17  ;;  %v528_v31 = vsel %vm527_vm1, %v491_v22, 0.0  ;;  %v495_v32 = vmul.f32 %v1201_v24, %v1683_v21  ;;  %v1205_v33 = vunpack.c.l.bf16 %v1265_v30 }
 0x149   : > { %595 = vadd.xlane.f32.xlu0 %v594_v43  ;;  %v524_v35 = vmul.f32 %v1686_v23, %v1258_v29  ;;  %v1209_v40 = vunpack.c.l.bf16 %v1266_v37  ;;  %v494_v42 = vmul.f32 %v1198_v36, %v1689_v25  ;;  %v1202_v43 = vunpack.c.h.bf16 %v1264_v19 }
 0x14a   : > { %592 = vadd.xlane.f32.xlu1 %v591_v48  ;;  %v621_v34 = vsel %vm527_vm1, %v522_v28, 0.0  ;;  %v540_v38 = vsel %vm527_vm1, %v495_v32, 0.0  ;;  %v497_v39 = vmul.f32 %v1205_v33, %v1683_v21  ;;  %v1213_v45 = vunpack.c.l.bf16 %v1267_v44 }
 0x14b   : > { %v627_v41 = vsel %vm527_vm1, %v524_v35, 0.0  ;;  %v499_v13 = vmul.f32 %v1209_v40, %v1683_v21  ;;  %v537_v46 = vsel %vm527_vm1, %v494_v42, 0.0  ;;  %v496_v47 = vmul.f32 %v1202_v43, %v1689_v25 }
 0x14c   : > { %v546_v23 = vsel %vm527_vm1, %v497_v39, 0.0  ;;  %v1206_v48 = vunpack.c.h.bf16 %v1265_v30  ;;  %v501_v51 = vmul.f32 %v1213_v45, %v1683_v21  ;;  %v1217_v52 = vunpack.c.l.bf16 %v1268_v49 }
 0x14d   : > { %601 = vadd.xlane.f32.xlu0 %v600_v54  ;;  %v552_v50 = vsel %vm527_vm1, %v499_v13, 0.0  ;;  %v543_v53 = vsel %vm527_vm1, %v496_v47, 0.0  ;;  %v1210_v55 = vunpack.c.h.bf16 %v1266_v37  ;;  %v1221_v59 = vunpack.c.l.bf16 %v1269_v56 }
 0x14e   : > { %598 = vadd.xlane.f32.xlu1 %v597_v58  ;;  %v498_v54 = vmul.f32 %v1206_v48, %v1689_v25  ;;  %v558_v57 = vsel %vm527_vm1, %v501_v51, 0.0  ;;  %v503_v58 = vmul.f32 %v1217_v52, %v1683_v21  ;;  %v1214_v62 = vunpack.c.h.bf16 %v1267_v44 }
 0x14f   : > { %v500_v61 = vmul.f32 %v1210_v55, %v1689_v25  ;;  %v1194_v4 = vunpack.c.h.bf16 %v1734_v10  ;;  %v1218_v8 = vunpack.c.h.bf16 %v1268_v49  ;;  %v1257_v12 = vunpack.c.l.bf16 %v1745_v26 }
 0x150   : > { %v549_v60 = vsel %vm527_vm1, %v498_v54, 0.0  ;;  %v564_v63 = vsel %vm527_vm1, %v503_v58, 0.0  ;;  %v744_v37 = vlaneseq }
 0x151   : > { %607 = vadd.xlane.f32.xlu0 %v606_v3  ;;  %v505_v3 = vmul.f32 %v1221_v59, %v1683_v21  ;;  %v555_v5 = vsel %vm527_vm1, %v500_v61, 0.0  ;;  %v504_v21 = vmul.f32 %v1218_v8, %v1689_v25  ;;  %v523_v16 = vmul.f32 %v1680_v18, %v1257_v12 }
 0x152   : > { %604 = vadd.xlane.f32.xlu1 %v603_v7  ;;  %v502_v7 = vmul.f32 %v1214_v62, %v1689_v25  ;;  %v747_v40 = vshrl.u32 %v744_v37, 7 }
 0x153   : > { %v570_v9 = vsel %vm527_vm1, %v505_v3, 0.0  ;;  %v567_v17 = vsel %vm527_vm1, %v504_v21, 0.0 }
 0x154   : > { %v561_v14 = vsel %vm527_vm1, %v502_v7, 0.0 }
 0x155   : > { %613 = vadd.xlane.f32.xlu0 %v612_v11  ;;  %v492_v11 = vmul.f32 %v1194_v4, %v1689_v25 }
 0x156   : > { %610 = vadd.xlane.f32.xlu1 %v609_v15  ;;  %v1222_v15 = vunpack.c.h.bf16 %v1269_v56 }
 0x157   : > { %v531_v10 = vsel %vm527_vm1, %v492_v11, 0.0 }
 0x158   : > { %v506_v19 = vmul.f32 %v1222_v15, %v1689_v25 }
 0x159   : > { %619 = vadd.xlane.f32.xlu0 %v618_v20  ;;  %v624_v20 = vsel %vm527_vm1, %v523_v16, 0.0 }
 0x15a   : > { %616 = vadd.xlane.f32.xlu1 %v615_v27  ;;  %v573_v22 = vsel %vm527_vm1, %v506_v19, 0.0 }
 0x15d   : > { %529 = vadd.xlane.f32.xlu0 %v528_v31 }
 0x15e   : > { %622 = vadd.xlane.f32.xlu1 %v621_v34 }
 0x161   : > { %541 = vadd.xlane.f32.xlu0 %v540_v38  ;;  %v745_v38 = vand.u32 127, %v744_v37 }
 0x162   : > { %628 = vadd.xlane.f32.xlu1 %v627_v41 }
 0x163   : > { %v750_v42 = vadd.s32 4294967288, %v745_v38  ;;  %v1804_v44 = vsub.s32 %v745_v38, %v747_v40 }
 0x165   : > { %547 = vadd.xlane.f32.xlu0 %v546_v23  ;;  %v1806_v45 = vsub.s32 %v750_v42, %v747_v40 }
 0x166   : > { %538 = vadd.xlane.f32.xlu1 %v537_v46 }
 0x169   : > { %553 = vadd.xlane.f32.xlu0 %v552_v50 }
 0x16a   : > { %544 = vadd.xlane.f32.xlu1 %v543_v53 }
 0x16d   : > { %559 = vadd.xlane.f32.xlu0 %v558_v57 }
 0x16e   : > { %550 = vadd.xlane.f32.xlu1 %v549_v60 }
 0x171   : > { %565 = vadd.xlane.f32.xlu0 %v564_v63 }
 0x172   : > { %556 = vadd.xlane.f32.xlu1 %v555_v5 }
 0x175   : > { %571 = vadd.xlane.f32.xlu0 %v570_v9 }
 0x176   : > { %562 = vadd.xlane.f32.xlu1 %v561_v14 }
 0x179   : > { %532 = vadd.xlane.f32.xlu0 %v531_v10 }
 0x17a   : > { %568 = vadd.xlane.f32.xlu1 %v567_v17 }
 0x17d   : > { %625 = vadd.xlane.f32.xlu0 %v624_v20 }
 0x17e   : > { %574 = vadd.xlane.f32.xlu1 %v573_v22 }
 0x181   : > { %577 = vadd.xlane.f32.xlu0 %v1718_v0 }
 0x182   : > { %580 = vadd.xlane.f32.xlu1 %v1721_v1 }
 0x185   : > { %631 = vadd.xlane.f32.xlu0 %v1724_v2 }
 0x186   : > { %634 = vadd.xlane.f32.xlu1 %v1729_v6 }
 0x1ce   : > { %v584_v18 = vpop.xlane.xlu0 %583 }
 0x1cf   : > { %v536_v24 = vpop.xlane.xlu1 %535  ;;  %v690_v53 = vmul.f32 0.015625, %v584_v18 }
 0x1d0   : > { %v1811_v58 = vmul.f32 0.015625, %v536_v24 }
 0x1d1   : > { %v832_v11 = vrot.slane %v690_v53, %v1804_v44 }
 0x1d2   : > { %v590_v26 = vpop.xlane.xlu0 %589  ;;  %v760_v10 = vrot.slane %v1811_v58, %v1804_v44 }
 0x1d3   : > { %v587_v27 = vpop.xlane.xlu1 %586  ;;  %v692_v47 = vmul.f32 0.015625, %v590_v26 }
 0x1d4   : > { %v691_v48 = vmul.f32 0.015625, %v587_v27 }
 0x1d5   : > { %v841_v62 = vrot.slane %v692_v47, %v1804_v44 }
 0x1d6   : > { %v596_v25 = vpop.xlane.xlu0 %595  ;;  %v836_v63 = vrot.slane %v691_v48, %v1806_v45 }
 0x1d7   : > { %v593_v28 = vpop.xlane.xlu1 %592  ;;  %v694_v50 = vmul.f32 0.015625, %v596_v25 }
 0x1d8   : > { %v693_v23 = vmul.f32 0.015625, %v593_v28  ;;  %v837_v20 = vsel %vm755_vm2, %v836_v63, %v832_v11 }
 0x1d9   : > { %v850_v5 = vrot.slane %v694_v50, %v1804_v44 }
 0x1da   : > { %v602_v29 = vpop.xlane.xlu0 %601  ;;  %v845_v54 = vrot.slane %v693_v23, %v1806_v45 }
 0x1db   : > { %v599_v30 = vpop.xlane.xlu1 %598  ;;  %v696_v55 = vmul.f32 0.015625, %v602_v29 }
 0x1dc   : > { %v695_v46 = vmul.f32 0.015625, %v599_v30  ;;  %v846_v12 = vsel %vm755_vm2, %v845_v54, %v841_v62 }
 0x1dd   : > { %v859_v14 = vrot.slane %v696_v55, %v1804_v44  ;;  %v924_v26 = vsel %vm910_vm3, %v846_v12, %v837_v20 }
 0x1de   : > { %v608_v31 = vpop.xlane.xlu0 %607  ;;  %v854_v59 = vrot.slane %v695_v46, %v1806_v45 }
 0x1df   : > { %v605_v32 = vpop.xlane.xlu1 %604  ;;  %v698_v60 = vmul.f32 0.015625, %v608_v31 }
 0x1e0   : > { %v697_v49 = vmul.f32 0.015625, %v605_v32  ;;  %v855_v16 = vsel %vm755_vm2, %v854_v59, %v850_v5 }
 0x1e1   : > { %v868_v17 = vrot.slane %v698_v60, %v1804_v44  ;;  %v925_v30 = vsel %vm912_vm4, %v855_v16, %v924_v26 }
 0x1e2   : > { %v614_v33 = vpop.xlane.xlu0 %613  ;;  %v863_v3 = vrot.slane %v697_v49, %v1806_v45 }
 0x1e3   : > { %v611_v34 = vpop.xlane.xlu1 %610  ;;  %v700_v4 = vmul.f32 0.015625, %v614_v33 }
 0x1e4   : > { %v699_v51 = vmul.f32 0.015625, %v611_v34  ;;  %v864_v22 = vsel %vm755_vm2, %v863_v3, %v859_v14 }
 0x1e5   : > { %v877_v18 = vrot.slane %v700_v4, %v1804_v44 }
 0x1e6   : > { %v620_v35 = vpop.xlane.xlu0 %619  ;;  %v872_v7 = vrot.slane %v699_v51, %v1806_v45 }
 0x1e7   : > { %v617_v0 = vpop.xlane.xlu1 %616  ;;  %v702_v8 = vmul.f32 0.015625, %v620_v35  ;;  %v926_v35 = vsel %vm914_vm5, %v864_v22, %v925_v30 }
 0x1e8   : > { %v701_v56 = vmul.f32 0.015625, %v617_v0  ;;  %v873_v27 = vsel %vm755_vm2, %v872_v7, %v868_v17 }
 0x1e9   : > { %v886_v25 = vrot.slane %v702_v8, %v1804_v44 }
 0x1ea   : > { %v530_v36 = vpop.xlane.xlu0 %529  ;;  %v881_v21 = vrot.slane %v701_v56, %v1806_v45 }
 0x1eb   : > { %v623_v1 = vpop.xlane.xlu1 %622  ;;  %v672_v24 = vmul.f32 0.015625, %v530_v36 }
 0x1ec   : > { %v703_v61 = vmul.f32 0.015625, %v623_v1  ;;  %v882_v31 = vsel %vm755_vm2, %v881_v21, %v877_v18 }
 0x1ed   : > { %v749_v37 = vrot.slane %v672_v24, %v1804_v44 }
 0x1ee   : > { %v1796_v2 = vpop.xlane.xlu0 %541  ;;  %v890_v19 = vrot.slane %v703_v61, %v1806_v45 }
 0x1ef   : > { %v1798_v6 = vpop.xlane.xlu1 %628  ;;  %v676_v32 = vmul.f32 0.015625, %v1796_v2 }
 0x1f0   : > { %v705_v0 = vmul.f32 0.015625, %v1798_v6  ;;  %v891_v1 = vsel %vm755_vm2, %v890_v19, %v886_v25 }
 0x1f1   : > { %v769_v6 = vrot.slane %v676_v32, %v1804_v44 }
 0x1f2   : > { %v1800_v39 = vpop.xlane.xlu0 %547  ;;  %v899_v50 = vrot.slane %v705_v0, %v1806_v45 }
 0x1f3   : > { %v539_v41 = vpop.xlane.xlu1 %538  ;;  %v678_v38 = vmul.f32 0.015625, %v1800_v39 }
 0x1f4   : > { %v675_v28 = vmul.f32 0.015625, %v539_v41  ;;  %v927_v41 = vsel %vm916_vm6, %v873_v27, %v926_v35 }
 0x1f5   : > { %v928_v46 = vsel %vm918_vm7, %v882_v31, %v927_v41 }
 0x1f6   : > { %v1802_v43 = vpop.xlane.xlu0 %553  ;;  %v764_v42 = vrot.slane %v675_v28, %v1806_v45  ;;  %v929_v39 = vsel %vm920_vm8, %v891_v1, %v928_v46 }
 0x1f7   : > { %v545_v13 = vpop.xlane.xlu1 %544  ;;  %v680_v2 = vmul.f32 0.015625, %v1802_v43  ;;  %v778_v43 = vrot.slane %v678_v38, %v1804_v44 }
 0x1f8   : > { %v677_v33 = vmul.f32 0.015625, %v545_v13  ;;  %v765_v58 = vsel %vm755_vm2, %v764_v42, %v760_v10 }
 0x1f9   : > { %v787_v59 = vrot.slane %v680_v2, %v1804_v44 }
 0x1fa   : > { %v1808_v52 = vpop.xlane.xlu0 %559  ;;  %v773_v47 = vrot.slane %v677_v33, %v1806_v45 }
 0x1fb   : > { %v551_v57 = vpop.xlane.xlu1 %550  ;;  %v682_v51 = vmul.f32 0.015625, %v1808_v52 }
 0x1fc   : > { %v679_v36 = vmul.f32 0.015625, %v551_v57  ;;  %v774_v52 = vsel %vm755_vm2, %v773_v47, %v769_v6 }
 0x1fd   : > { %v796_v7 = vrot.slane %v682_v51, %v1804_v44 }
 0x1fe   : > { %v566_v9 = vpop.xlane.xlu0 %565  ;;  %v782_v53 = vrot.slane %v679_v36, %v1806_v45 }
 0x1ff   : > { %v557_v15 = vpop.xlane.xlu1 %556  ;;  %v684_v55 = vmul.f32 0.015625, %v566_v9 }
 0x200   : > { %v681_v40 = vmul.f32 0.015625, %v557_v15  ;;  %v783_v8 = vsel %vm755_vm2, %v782_v53, %v778_v43 }
 0x201   : > { %v805_v12 = vrot.slane %v684_v55, %v1804_v44 }
 0x202   : > { %v572_v29 = vpop.xlane.xlu0 %571  ;;  %v791_v56 = vrot.slane %v681_v40, %v1806_v45 }
 0x203   : > { %v563_v34 = vpop.xlane.xlu1 %562  ;;  %v686_v60 = vmul.f32 0.015625, %v572_v29 }
 0x204   : > { %v683_v23 = vmul.f32 0.015625, %v563_v34  ;;  %v792_v14 = vsel %vm755_vm2, %v791_v56, %v787_v59 }
 0x205   : > { %v814_v10 = vrot.slane %v686_v60, %v1804_v44 }
 0x206   : > { %v533_v13 = vpop.xlane.xlu0 %532  ;;  %v800_v61 = vrot.slane %v683_v23, %v1806_v45 }
 0x207   : > { %v673_v48 = vmul.f32 0.015625, %v533_v13  ;;  %v569_v49 = vpop.xlane.xlu1 %568 }
 0x208   : > { %v685_v54 = vmul.f32 0.015625, %v569_v49  ;;  %v801_v16 = vsel %vm755_vm2, %v800_v61, %v796_v7 }
 0x209   : > { %v754_v57 = vrot.slane %v673_v48, %v1806_v45 }
 0x20a   : > { %v626_v62 = vpop.xlane.xlu0 %625  ;;  %v809_v3 = vrot.slane %v685_v54, %v1806_v45 }
 0x20b   : > { %v756_v63 = vsel %vm755_vm2, %v754_v57, %v749_v37  ;;  %v704_v4 = vmul.f32 0.015625, %v626_v62  ;;  %v575_v5 = vpop.xlane.xlu1 %574 }
 0x20c   : > { %v911_v9 = vsel %vm910_vm3, %v765_v58, %v756_v63  ;;  %v687_v11 = vmul.f32 0.015625, %v575_v5  ;;  %v810_v26 = vsel %vm755_vm2, %v809_v3, %v805_v12 }
 0x20d   : > { %v913_v21 = vsel %vm912_vm4, %v774_v52, %v911_v9  ;;  %v895_v15 = vrot.slane %v704_v4, %v1804_v44 }
 0x20e   : > { %v818_v17 = vrot.slane %v687_v11, %v1806_v45  ;;  %v578_v19 = vpop.xlane.xlu0 %577  ;;  %v915_v20 = vsel %vm914_vm5, %v783_v8, %v913_v21 }
 0x20f   : > { %v688_v22 = vmul.f32 0.015625, %v578_v19  ;;  %v581_v18 = vpop.xlane.xlu1 %580  ;;  %v900_v24 = vsel %vm755_vm2, %v899_v50, %v895_v15  ;;  %v917_v27 = vsel %vm916_vm6, %v792_v14, %v915_v20 }
 0x210   : > { %v689_v25 = vmul.f32 0.015625, %v581_v18  ;;  %v930_v28 = vsel %vm922_vm9, %v900_v24, %v929_v39  ;;  %v819_v29 = vsel %vm755_vm2, %v818_v17, %v814_v10  ;;  %v919_v30 = vsel %vm918_vm7, %v801_v16, %v917_v27 }
 0x211   : > { %967 = vxpose.xlu1.b32.start [1/2] (short) (narrow) %v930_v28, 16  ;;  %v921_v31 = vsel %vm920_vm8, %v810_v26, %v919_v30  ;;  %v823_v32 = vrot.slane %v688_v22, %v1804_v44 }
 0x212   : > { %v827_v33 = vrot.slane %v689_v25, %v1806_v45  ;;  %v632_v34 = vpop.xlane.xlu0 %631  ;;  %v923_v35 = vsel %vm922_vm9, %v819_v29, %v921_v31 }
 0x213   : > { %v706_v0 = vmul.f32 0.015625, %v632_v34  ;;  %v635_v36 = vpop.xlane.xlu1 %634  ;;  %935 = vxpose.xlu0.b32.start [1/2] (short) (narrow) %v923_v35, 16 }
 0x214   : > { %v707_v1 = vmul.f32 0.015625, %v635_v36  ;;  %v828_v40 = vsel %vm755_vm2, %v827_v33, %v823_v32 }
 0x215   : > { %v904_v37 = vrot.slane %v706_v0, %v1804_v44 }
 0x216   : > { %v908_v38 = vrot.slane %v707_v1, %v1806_v45 }
 0x217   : > { %936 = vxpose.xlu0.b32.end [2/2] (short) (narrow) %v828_v40, 16 }
 0x218   : > { %v909_v41 = vsel %vm755_vm2, %v908_v38, %v904_v37 }
 0x219   : > { %968 = vxpose.xlu1.b32.end [2/2] (short) (narrow) %v909_v41, 16 }
 0x293   : > { %v951_v42 = vpop.trf.xlu0 }
 0x294   : > { %1000 = vst.msk [vmem:[%s301_s28] sm:$0xff] %vm999_vm10, %v951_v42  ;;  %1010 = sbr.rel (!%p1612_p13) target bundleno = 675 (0x2a3), region = 81 }
 0x295   : > { %v983_v2 = vpop.trf.xlu1 }
 0x296   : > { %1002 = vst.msk [vmem:[%s301_s28 + $0x10] sm:$0xff] %vm999_vm10, %v983_v2 }
 0x297   : > { %v952_v23 = vpop.trf.xlu0 }
 0x298   : > { %1001 = vst.msk [vmem:[%s301_s28 + $0x8] sm:$0xff] %vm999_vm10, %v952_v23 }
 0x299   : > { %v984_v13 = vpop.trf.xlu1 }
 0x29a   : > { %1003 = vst.msk [vmem:[%s301_s28 + $0x18] sm:$0xff] %vm999_vm10, %v984_v13 }
 0x29b   : > { %v1049_v44 = vld [vmem:[%s301_s28] sm:$0xff] }
 0x29c   : > { %1050 = vst [vmem:[%s1015_s23] sm:$0xff] %v1049_v44 }
 0x29d   : > { %v1053_v46 = vld [vmem:[%s301_s28 + $0x10] sm:$0xff] }
 0x29e   : > { %1054 = vst [vmem:[%s1015_s23 + $0x20] sm:$0xff] %v1053_v46 }
 0x29f   : > { %v1051_v45 = vld [vmem:[%s301_s28 + $0x8] sm:$0xff] }
 0x2a0   : > { %1052 = vst [vmem:[%s1015_s23 + $0x8] sm:$0xff] %v1051_v45 }
 0x2a1   : > { %v1055_v6 = vld [vmem:[%s301_s28 + $0x18] sm:$0xff] }
 0x2a2   : > { %1056 = vst [vmem:[%s1015_s23 + $0x28] sm:$0xff] %v1055_v6 }
 0x2a3 PF: > { %s16_s21 = sadd.s32 1, %s1489_s21   ;;  %s1940_s18 = sld [smem:[#allocation10_spill]] }
 0x2a4   : > { %p13_p4 = scmp.ge.s32.totalorder %s16_s21, 10   ;;  %s1941_s8 = sld [smem:[#allocation11_spill]] }
 0x2a5   : > { %s1942_s20 = sld [smem:[#allocation12_spill]]  ;;  %s1943_s12 = smov %s1457_s13 }
 0x2a6   : > { %s1944_s13 = smov %s1461_s14  ;;  %s1945_s14 = smov %s1607_s7 }
 0x2a7   : > { %s1946_s15 = smov %s1469_s16  ;;  %s1947_s16 = smov %s1604_s6 }
 0x2a8   : > { %s1948_s17 = smov %s1481_s19  ;;  %15 = sbr.rel (!%p13_p4) target bundleno = 8 (0x8), region = 165 }
 0x2aa   : > { %s1949_s19 = smov %s1941_s8 }
 0x2af   :  { %1072 = vsyncpa [#allocation4], 1 }
 0x2b0   :  { %1074 = vsyncpa [#allocation4 + $0x1], 1 }

</bundles_post_ra>
